<compile_context>
chip_gen: v7x
topology: tpu7x:2x2x1
jax: 0.10.0
libtpu: 0.0.40
codegen_flags: <defaults>
</compile_context>

<pallas_src>
import functools

import jax
import jax.numpy as jnp
from jax.experimental import pallas as pl
from jax.experimental.pallas import tpu as pltpu

BN_EPS = 1e-5
LANE = 128
C_PAD = 128          # padded channel width -> lane-dense matmuls and stores
MAX_TILE = 512       # node-tile sweet spot for the memory-bound A_hat stream


# ------------------------------ small helpers ----------------------------------
def _round_up(x, m):
    return ((x + m - 1) // m) * m


def _vmem_limit_bytes():
    """Per-generation scoped-VMEM limit: 3/4 of physical, clamped to [32, 96] MiB.
    v5e/v6e (128 MiB physical) -> 96 MiB, v7x (64 MiB per TC) -> 48 MiB."""
    cap = 64 * 1024 * 1024
    try:
        info = pltpu.get_tpu_info()
        cap = int(getattr(info, "vmem_capacity_bytes", cap) or cap)
    except Exception:
        pass
    lim = (cap * 3) // 4
    return max(32 * 1024 * 1024, min(lim, 96 * 1024 * 1024))


def _choose_tiling(n):
    """Pick TM==TK (multiple of 128) and n_pad (multiple of the tile)."""
    n128 = _round_up(n, LANE)
    if n128 <= 1024:                       # whole graph in a single (row, k) tile
        return n128, n128
    n512 = _round_up(n128, MAX_TILE)
    if n512 - n128 <= n128 // 8:           # <=12.5% extra padded rows
        return MAX_TILE, n512
    for t in (384, 256, 128):
        if n128 % t == 0:
            return t, n128
    return LANE, n128


# ----------------------------- Pallas kernels ----------------------------------
def _gcn_layer_kernel(a_ref, h_ref, w_ref, b_ref, o_ref, acc_ref, *,
                      relu, tk, h_resident):
    """One GCN layer (BN + bias folded into W', b'):
         H_out[i] = act( (sum_k A[i,k] @ H[k]) @ W' + b' )
    Aggregate-then-transform: the O(N^2) aggregation runs at channel width once
    per row tile; the small transform happens once per row tile at k == last."""
    k = pl.program_id(1)

    @pl.when(k == 0)
    def _():
        acc_ref[...] = jnp.zeros_like(acc_ref)

    if h_resident:
        # H is DMA'd into VMEM once (constant block index); slice the k-chunk here.
        h_blk = h_ref[pl.ds(pl.multiple_of(k * tk, tk), tk), :]
    else:
        h_blk = h_ref[...]

    # bf16 x bf16 aggregation on the MXU, f32 accumulate (dominant N^2 term).
    acc_ref[...] += jnp.dot(a_ref[...], h_blk, preferred_element_type=jnp.float32)

    @pl.when(k == pl.num_programs(1) - 1)
    def _():
        # epilogue transform: bf16 x bf16 MXU pass, f32 accumulation
        h = jnp.dot(acc_ref[...].astype(jnp.bfloat16), w_ref[...],
                    preferred_element_type=jnp.float32) + b_ref[...]
        if relu:   # F.relu ; F.dropout(p=0.1, training=False) == identity
            h = jnp.maximum(h, 0.0)
        o_ref[...] = h.astype(o_ref.dtype)


def _gcn_final_kernel(a_ref, h_ref, w_ref, b_ref, p_ref, o_ref, acc_ref, *,
                      tk, h_resident):
    """Last GCN layer (no ReLU) fused with global_mean_pool.
    Emits a per-row-tile partial pool  P[:, tile_i] @ H3[tile_i]  so the row axis
    stays 'parallel' (v7x megacore, no output race); partials summed in wrapper."""
    k = pl.program_id(1)

    @pl.when(k == 0)
    def _():
        acc_ref[...] = jnp.zeros_like(acc_ref)

    if h_resident:
        h_blk = h_ref[pl.ds(pl.multiple_of(k * tk, tk), tk), :]
    else:
        h_blk = h_ref[...]

    acc_ref[...] += jnp.dot(a_ref[...], h_blk, preferred_element_type=jnp.float32)

    @pl.when(k == pl.num_programs(1) - 1)
    def _():
        h3 = jnp.dot(acc_ref[...].astype(jnp.bfloat16), w_ref[...],
                     preferred_element_type=jnp.float32) + b_ref[...]
        # partial mean pooling for this row tile (padded rows have zero weight)
        o_ref[0] = jnp.dot(p_ref[...], h3, preferred_element_type=jnp.float32)


# --------------------------- BlockSpec / call builders --------------------------
def _a_spec(tm, tk, ksteps):
    # 3-deep buffering on the streaming A_hat operand hides HBM latency jitter
    # along the reduction axis; only worthwhile with >=3 k-steps.
    if ksteps >= 3:
        return pl.BlockSpec((tm, tk), lambda i, k: (i, k),
                            pipeline_mode=pl.Buffered(3))
    return pl.BlockSpec((tm, tk), lambda i, k: (i, k))


def _h_spec(n_pad, tk, c, h_resident):
    if h_resident:
        return pl.BlockSpec((n_pad, c), lambda i, k: (0, 0))   # DMA'd once
    return pl.BlockSpec((tk, c), lambda i, k: (k, 0))          # re-fetched per row tile


def _layer_call(adj, h, w, b, *, relu, tm, tk, h_resident, vmem_limit):
    n_pad = adj.shape[0]
    c = w.shape[1]
    grid = (n_pad // tm, n_pad // tk)
    h_reads = 1 if h_resident else grid[0]
    flops = 2 * n_pad * n_pad * c + 2 * n_pad * c * c
    bytes_accessed = (adj.size * 2 + h_reads * h.size * 2
                      + w.size * 2 + b.size * 4 + n_pad * c * 2)
    kernel = functools.partial(_gcn_layer_kernel, relu=relu, tk=tk,
                               h_resident=h_resident)
    return pl.pallas_call(
        kernel,
        out_shape=jax.ShapeDtypeStruct((n_pad, c), jnp.bfloat16),
        grid_spec=pltpu.PrefetchScalarGridSpec(
            num_scalar_prefetch=0,
            grid=grid,
            in_specs=[
                _a_spec(tm, tk, grid[1]),                     # A_hat tile (bf16)
                _h_spec(n_pad, tk, c, h_resident),            # H          (bf16)
                pl.BlockSpec((c, c), lambda i, k: (0, 0)),    # W' folded  (bf16)
                pl.BlockSpec((1, c), lambda i, k: (0, 0)),    # b' folded  (f32)
            ],
            out_specs=pl.BlockSpec((tm, c), lambda i, k: (i, 0)),
            scratch_shapes=[pltpu.VMEM((tm, c), jnp.float32)],
        ),
        compiler_params=pltpu.CompilerParams(
            dimension_semantics=("parallel", "arbitrary"),
            vmem_limit_bytes=vmem_limit,
        ),
        cost_estimate=pl.CostEstimate(
            flops=flops, bytes_accessed=bytes_accessed, transcendentals=0),
    )(adj, h, w, b)


def _final_call(adj, h, w, b, pool, *, tm, tk, h_resident, vmem_limit):
    n_pad = adj.shape[0]
    c = w.shape[1]
    g = pool.shape[0]
    nrt = n_pad // tm
    grid = (nrt, n_pad // tk)
    h_reads = 1 if h_resident else nrt
    flops = 2 * n_pad * n_pad * c + 2 * n_pad * c * c + 2 * g * n_pad * c
    bytes_accessed = (adj.size * 2 + h_reads * h.size * 2 + w.size * 2
                      + b.size * 4 + pool.size * 4 + nrt * g * c * 4)
    kernel = functools.partial(_gcn_final_kernel, tk=tk, h_resident=h_resident)
    return pl.pallas_call(
        kernel,
        out_shape=jax.ShapeDtypeStruct((nrt, g, c), jnp.float32),
        grid_spec=pltpu.PrefetchScalarGridSpec(
            num_scalar_prefetch=0,
            grid=grid,
            in_specs=[
                _a_spec(tm, tk, grid[1]),                     # A_hat tile (bf16)
                _h_spec(n_pad, tk, c, h_resident),            # H2         (bf16)
                pl.BlockSpec((c, c), lambda i, k: (0, 0)),    # W' folded  (bf16)
                pl.BlockSpec((1, c), lambda i, k: (0, 0)),    # b' folded  (f32)
                pl.BlockSpec((g, tm), lambda i, k: (0, i)),   # mean-pool  (f32)
            ],
            # per-row-tile partial pools -> row axis can be 'parallel' (megacore)
            out_specs=pl.BlockSpec((1, g, c), lambda i, k: (i, 0, 0)),
            scratch_shapes=[pltpu.VMEM((tm, c), jnp.float32)],
        ),
        compiler_params=pltpu.CompilerParams(
            dimension_semantics=("parallel", "arbitrary"),
            vmem_limit_bytes=vmem_limit,
        ),
        cost_estimate=pl.CostEstimate(
            flops=flops, bytes_accessed=bytes_accessed, transcendentals=0),
    )(adj, h, w, b, pool)


# ------------------------------ JAX wrapper -------------------------------------
def build_norm_adj_padded(edge_index, num_nodes, n_pad, dtype=jnp.bfloat16):
    """Dense D^-1/2 (A+I) D^-1/2 (PyG gcn_norm, add_self_loops=True), scattered
    directly into the zero-padded `dtype` buffer (no dense f32 N x N intermediate).
    A_hat[dst, src] = dinv[dst]*dinv[src]; padded rows/cols stay exactly zero."""
    src, dst = edge_index[0], edge_index[1]
    loops = jnp.arange(num_nodes, dtype=src.dtype)
    src = jnp.concatenate([src, loops])
    dst = jnp.concatenate([dst, loops])
    deg = jnp.zeros((num_nodes,), jnp.float32).at[dst].add(1.0)
    dinv = jnp.where(deg > 0, jax.lax.rsqrt(deg), 0.0)
    norm = (dinv[dst] * dinv[src]).astype(dtype)
    return jnp.zeros((n_pad, n_pad), dtype).at[dst, src].add(norm)


def build_mean_pool_padded(batch, num_graphs, n_pad):
    n = batch.shape[0]
    batch_p = jnp.full((n_pad,), -1, batch.dtype).at[:n].set(batch)
    onehot = (batch_p[None, :] == jnp.arange(num_graphs)[:, None]).astype(jnp.float32)
    counts = jnp.maximum(onehot.sum(axis=1, keepdims=True), 1.0)
    return onehot / counts                     # [G, n_pad]


def fold_bn(w, b, g, be, m, v):
    """Fold eval-mode BatchNorm1d + conv bias into the GCNConv weight (exact:
    BN scale is per-output-channel, A_hat acts on rows)."""
    s = g * jax.lax.rsqrt(v + BN_EPS)          # [1, C_out]
    return w * s, (b - m) * s + be


def _pad2(x, rows, cols):
    r, c = x.shape
    return jnp.pad(x, ((0, rows - r), (0, cols - c)))


def gcn_feature_extractor(x, edge_index, batch, params, num_graphs):
    n = x.shape[0]
    out_channels = params["w3"].shape[1]

    tile, n_pad = _choose_tiling(n)            # TM == TK, n_pad % tile == 0
    vmem_limit = _vmem_limit_bytes()

    # keep H fully VMEM-resident when it fits next to the streaming A tiles,
    # out blocks, accumulator and weights (all double/triple buffered).
    h_bytes = 2 * n_pad * C_PAD * 2            # bf16, x2 buffers
    fixed_bytes = (3 * tile * tile * 2 + 2 * tile * C_PAD * 2
                   + tile * C_PAD * 4 + 4 * C_PAD * C_PAD)
    h_resident = (h_bytes + fixed_bytes) <= vmem_limit - (4 << 20)

    adj_p = build_norm_adj_padded(edge_index, n, n_pad)       # bf16, built padded
    pool_p = build_mean_pool_padded(batch, num_graphs, n_pad)  # f32 [G, n_pad]
    x_p = _pad2(x, n_pad, C_PAD).astype(jnp.bfloat16)

    # fold BN + bias; zero-pad channels to 128 lanes (exact: zero rows/cols)
    folded = []
    for i in (1, 2, 3):
        w_f, b_f = fold_bn(params[f"w{i}"], params[f"b{i}"], params[f"g{i}"],
                           params[f"be{i}"], params[f"m{i}"], params[f"v{i}"])
        folded.append((_pad2(w_f, C_PAD, C_PAD).astype(jnp.bfloat16),
                       _pad2(b_f, 1, C_PAD)))
    (w1, b1), (w2, b2), (w3, b3) = folded

    kw = dict(tm=tile, tk=tile, h_resident=h_resident, vmem_limit=vmem_limit)
    h = _layer_call(adj_p, x_p, w1, b1, relu=True, **kw)
    h = _layer_call(adj_p, h, w2, b2, relu=True, **kw)
    partials = _final_call(adj_p, h, w3, b3, pool_p, **kw)    # fused mean-pool
    return partials.sum(axis=0)[:, :out_channels]


# --------------------------- reference (plain JAX, f32) --------------------------
def reference(x, edge_index, batch, params, num_graphs):
    n = x.shape[0]
    adj = build_norm_adj_padded(edge_index, n, n, dtype=jnp.float32)
    pool = build_mean_pool_padded(batch, num_graphs, n)
    h = x
    for i, relu in ((1, True), (2, True), (3, False)):
        w, b = params[f"w{i}"], params[f"b{i}"]
        g, be, m, v = params[f"g{i}"], params[f"be{i}"], params[f"m{i}"], params[f"v{i}"]
        h = adj @ (h @ w) + b
        h = (h - m) * (g * jax.lax.rsqrt(v + BN_EPS)) + be
        if relu:
            h = jnp.maximum(h, 0.0)
    return pool @ h


# ------------------------------------ main ---------------------------------------
if __name__ == "__main__":
    key = jax.random.PRNGKey(0)

    in_channels, hidden_channels, out_channels = 8, 32, 16
    num_nodes, num_graphs = 16, 2

    key, k = jax.random.split(key)
    x = jax.random.normal(k, (num_nodes, in_channels), jnp.float32)

    # two graphs of 8 nodes each, bidirectional ring inside each graph
    src_list, dst_list = [], []
    for g in range(num_graphs):
        base = g * 8
        for i in range(8):
            a, b = base + i, base + (i + 1) % 8
            src_list += [a, b]
            dst_list += [b, a]
    edge_index = jnp.array([src_list, dst_list], dtype=jnp.int32)
    batch = jnp.repeat(jnp.arange(num_graphs, dtype=jnp.int32), 8)

    # deterministic synthetic parameters (GCNConv weight [Cin,Cout] + bias,
    # BatchNorm1d gamma/beta/running_mean/running_var as [1,C] rows)
    dims = [(in_channels, hidden_channels),
            (hidden_channels, hidden_channels),
            (hidden_channels, out_channels)]
    params = {}
    for i, (ci, co) in enumerate(dims, start=1):
        key, kw_, kb, kg, kbe, km, kv = jax.random.split(key, 7)
        params[f"w{i}"] = 0.2 * jax.random.normal(kw_, (ci, co), jnp.float32)
        params[f"b{i}"] = 0.1 * jax.random.normal(kb, (1, co), jnp.float32)
        params[f"g{i}"] = 1.0 + 0.1 * jax.random.normal(kg, (1, co), jnp.float32)
        params[f"be{i}"] = 0.1 * jax.random.normal(kbe, (1, co), jnp.float32)
        params[f"m{i}"] = 0.05 * jax.random.normal(km, (1, co), jnp.float32)
        params[f"v{i}"] = 1.0 + 0.1 * jax.nn.softplus(
            jax.random.normal(kv, (1, co), jnp.float32))

    out = gcn_feature_extractor(x, edge_index, batch, params, num_graphs)
    out = jax.block_until_ready(out)

    ref = reference(x, edge_index, batch, params, num_graphs)
    assert out.shape == (num_graphs, out_channels)
    # A_hat / activations / weights ride the MXU in bf16 (f32 accumulation), so the
    # comparison against the pure-f32 reference uses bf16-appropriate tolerances.
    assert jnp.allclose(out, ref, rtol=3e-2, atol=3e-2), "mismatch vs JAX reference"

    print("KERNEL_OK")
</pallas_src>

<mosaic_0001>
module attributes {stable_mosaic.version = 11 : i64} {
  func.func @_gcn_layer_kernel(%arg0: i32, %arg1: i32, %arg2: memref<128x128xbf16, #tpu.memory_space<vmem>>, %arg3: memref<128x128xbf16, #tpu.memory_space<vmem>>, %arg4: memref<128x128xbf16, #tpu.memory_space<vmem>>, %arg5: memref<1x128xf32, #tpu.memory_space<vmem>>, %arg6: memref<128x128xbf16, #tpu.memory_space<vmem>>, %arg7: memref<128x128xf32, #tpu.memory_space<vmem>>) attributes {dimension_semantics = [#tpu.dimension_semantics<parallel>, #tpu.dimension_semantics<arbitrary>], iteration_bounds = array<i64: 1, 1>, scalar_prefetch = 0 : i64, scratch_operands = 1 : i64, tpu.core_type = #tpu.core_type<tc>, window_params = [{transform_indices = @transform_0, window_bounds = array<i64: 128, 128>}, {pipeline_mode = #tpu.pipeline_mode<synchronous>, transform_indices = @transform_1, window_bounds = array<i64: 128, 128>}, {pipeline_mode = #tpu.pipeline_mode<synchronous>, transform_indices = @transform_2, window_bounds = array<i64: 128, 128>}, {pipeline_mode = #tpu.pipeline_mode<synchronous>, transform_indices = @transform_3, window_bounds = array<i64: 1, 128>}, {transform_indices = @transform_4, window_bounds = array<i64: 128, 128>}]} {
    %c0_i32 = arith.constant 0 : i32
    %0 = arith.cmpi eq, %arg1, %c0_i32 : i32
    %1 = arith.extui %0 : i1 to i32
    %c0_i32_0 = arith.constant 0 : i32
    %2 = arith.cmpi ne, %1, %c0_i32_0 : i32
    scf.if %2 {
      %cst_9 = arith.constant 0.000000e+00 : f32
      %15 = vector.broadcast %cst_9 : f32 to vector<128x128xf32>
      %c0_10 = arith.constant 0 : index
      %c0_11 = arith.constant 0 : index
      %16 = vector.load %arg7[%c0_10, %c0_11] : memref<128x128xf32, #tpu.memory_space<vmem>>, vector<128x128xf32>
      tpu.vector_store %arg7[%c0_10, %c0_11], %15 {strides = array<i32>} : memref<128x128xf32, #tpu.memory_space<vmem>>, vector<128x128xf32>,
    } else {
    }
    %c128_i32 = arith.constant 128 : i32
    %3 = arith.muli %arg1, %c128_i32 : i32
    %4 = tpu.assume_multiple %3, 128 : i32
    %5 = arith.index_cast %4 : i32 to index
    %c0 = arith.constant 0 : index
    %6 = vector.load %arg3[%5, %c0] : memref<128x128xbf16, #tpu.memory_space<vmem>>, vector<128x128xbf16>
    %c0_1 = arith.constant 0 : index
    %c0_2 = arith.constant 0 : index
    %7 = vector.load %arg7[%c0_1, %c0_2] : memref<128x128xf32, #tpu.memory_space<vmem>>, vector<128x128xf32>
    %c0_3 = arith.constant 0 : index
    %c0_4 = arith.constant 0 : index
    %8 = vector.load %arg2[%c0_3, %c0_4] : memref<128x128xbf16, #tpu.memory_space<vmem>>, vector<128x128xbf16>
    %cst = arith.constant dense<0.000000e+00> : vector<128x128xf32>
    %9 = tpu.matmul %8, %6, %cst {dimension_numbers = #tpu.dot_dimension_numbers<[1], [0], [0], [1], [0, 0, 1, 1], [], []>} : vector<128x128xbf16>, vector<128x128xbf16>, vector<128x128xf32> -> vector<128x128xf32>
    %10 = arith.addf %7, %9 : vector<128x128xf32>
    %c0_5 = arith.constant 0 : index
    %c0_6 = arith.constant 0 : index
    %11 = vector.load %arg7[%c0_5, %c0_6] : memref<128x128xf32, #tpu.memory_space<vmem>>, vector<128x128xf32>
    tpu.vector_store %arg7[%c0_5, %c0_6], %10 {strides = array<i32>} : memref<128x128xf32, #tpu.memory_space<vmem>>, vector<128x128xf32>,
    %c0_i32_7 = arith.constant 0 : i32
    %12 = arith.cmpi eq, %arg1, %c0_i32_7 : i32
    %13 = arith.extui %12 : i1 to i32
    %c0_i32_8 = arith.constant 0 : i32
    %14 = arith.cmpi ne, %13, %c0_i32_8 : i32
    scf.if %14 {
      %c0_9 = arith.constant 0 : index
      %c0_10 = arith.constant 0 : index
      %15 = vector.load %arg7[%c0_9, %c0_10] : memref<128x128xf32, #tpu.memory_space<vmem>>, vector<128x128xf32>
      %16 = arith.truncf %15 : vector<128x128xf32> to vector<128x128xbf16>
      %c0_11 = arith.constant 0 : index
      %c0_12 = arith.constant 0 : index
      %17 = vector.load %arg4[%c0_11, %c0_12] : memref<128x128xbf16, #tpu.memory_space<vmem>>, vector<128x128xbf16>
      %cst_13 = arith.constant dense<0.000000e+00> : vector<128x128xf32>
      %18 = tpu.matmul %16, %17, %cst_13 {dimension_numbers = #tpu.dot_dimension_numbers<[1], [0], [0], [1], [0, 0, 1, 1], [], []>} : vector<128x128xbf16>, vector<128x128xbf16>, vector<128x128xf32> -> vector<128x128xf32>
      %c0_14 = arith.constant 0 : index
      %c0_15 = arith.constant 0 : index
      %19 = vector.load %arg5[%c0_14, %c0_15] : memref<1x128xf32, #tpu.memory_space<vmem>>, vector<1x128xf32>
      %20 = vector.broadcast %19 : vector<1x128xf32> to vector<128x128xf32>
      %21 = arith.addf %18, %20 : vector<128x128xf32>
      %cst_16 = arith.constant 0.000000e+00 : f32
      %22 = vector.broadcast %cst_16 : f32 to vector<128x128xf32>
      %23 = arith.maximumf %21, %22 : vector<128x128xf32>
      %24 = arith.truncf %23 : vector<128x128xf32> to vector<128x128xbf16>
      %c0_17 = arith.constant 0 : index
      %c0_18 = arith.constant 0 : index
      %25 = vector.load %arg6[%c0_17, %c0_18] : memref<128x128xbf16, #tpu.memory_space<vmem>>, vector<128x128xbf16>
      tpu.vector_store %arg6[%c0_17, %c0_18], %24 {strides = array<i32>} : memref<128x128xbf16, #tpu.memory_space<vmem>>, vector<128x128xbf16>,
    } else {
    }
    return
  }
  func.func @transform_0(%arg0: i32, %arg1: i32) -> (i32, i32) {
    %c0_i32 = arith.constant 0 : i32
    return %arg0, %arg1 : i32, i32
  }
  func.func @transform_1(%arg0: i32, %arg1: i32) -> (i32, i32) {
    %c0_i32 = arith.constant 0 : i32
    %c0_i32_0 = arith.constant 0 : i32
    %c0_i32_1 = arith.constant 0 : i32
    return %c0_i32, %c0_i32_0 : i32, i32
  }
  func.func @transform_2(%arg0: i32, %arg1: i32) -> (i32, i32) {
    %c0_i32 = arith.constant 0 : i32
    %c0_i32_0 = arith.constant 0 : i32
    %c0_i32_1 = arith.constant 0 : i32
    return %c0_i32, %c0_i32_0 : i32, i32
  }
  func.func @transform_3(%arg0: i32, %arg1: i32) -> (i32, i32) {
    %c0_i32 = arith.constant 0 : i32
    %c0_i32_0 = arith.constant 0 : i32
    %c0_i32_1 = arith.constant 0 : i32
    return %c0_i32, %c0_i32_0 : i32, i32
  }
  func.func @transform_4(%arg0: i32, %arg1: i32) -> (i32, i32) {
    %c0_i32 = arith.constant 0 : i32
    %c0_i32_0 = arith.constant 0 : i32
    return %arg0, %c0_i32 : i32, i32
  }
}

</mosaic_0001>

<bundles_post_ra>
// kernel: tpu_custom_call.1
= control target key start
LH: loop header
LB: loop body
LE: loop exit
PB: predicated region body
PF: predicated region fallthrough
CT: control target
= control target key end

     0   :  { %9 = vsyncpa [#allocation4], 0  ;;  %s1094_s0 = inlined_call_operand.hbm [shape: bf16[128,128], index: 0, kind: input, shape index: {}]   ;;  %s1095_s1 = inlined_call_operand.hbm [shape: bf16[128,128], index: 1, kind: input, shape index: {}]   ;;  %s1096_s2 = inlined_call_operand.hbm [shape: bf16[128,128], index: 2, kind: input, shape index: {}]   ;;  %s1097_s3 = inlined_call_operand.vmem [shape: f32[1,128], index: 3, kind: input, shape index: {}]   ;;  %s1098_s4 = inlined_call_operand.hbm [shape: bf16[128,128], index: 4, kind: output, shape index: {}]  }
   0x1   :  { %10 = vsyncpa [#allocation7], 0 }
   0x2   :  { %11 = vsyncpa [#allocation5], 0  ;;  %s993_s15 = smov [#allocation6]   ;;  %s994_s17 = smov [#allocation3]  }
   0x3   :  { %s29_s16 = sshll.u32 %s993_s15, 4  ;;  %s17_s18 = sshll.u32 %s994_s17, 4  ;;  %s30_s16 = int_to_ptr.vmem [resolvable:$true] %s29_s16  ;;  %s1024_s18 = int_to_ptr.vmem [resolvable:$true] %s17_s18 }
   0x4   :  { %s899_s21 = scalar_lea.hbm %s1095_s1, 1024 }
   0x5   :  { %p900_p0 = scmp.ne.s32.totalorder %s1095_s1, %s899_s21  ;;  %p903_p1 = scmp.lt.u32.totalorder %s899_s21, %s1095_s1 }
   0x7   :  { %p905_p2 = pnand %p903_p1, %p900_p0 }
   0x9   :  { %908 = shalt.err (!%p905_p2)
}
   0xa   :  { %s909_s26 = scalar_lea.vmem %s30_s16, 1024  ;;  %p914_p4 = scmp.lt.s32.totalorder %s30_s16, %s30_s16 }
   0xb   :  { %p910_p3 = scmp.ne.s32.totalorder %s30_s16, %s909_s26  ;;  %p915_p5 = scmp.lt.s32.totalorder %s909_s26, %s909_s26 }
   0xd   :  { %p916_p6 = por %p915_p5, %p914_p4 }
   0xf   :  { %p917_p7 = pnand %p916_p6, %p910_p3 }
  0x11   :  { %920 = shalt.err (!%p917_p7)
}
  0x12   :  { %s995_s27 = smov 64   ;;  %s996_s28 = smov 4  }
  0x13   :  { %35 = dma.hbm_to_vmem [thread:$0]  %s1095_s1, 1024, %s30_s16, [#allocation7], %s995_s27, %s995_s27, %s996_s28  }
  0x14   :  { %s921_s7 = scalar_lea.hbm %s1094_s0, 1024 }
  0x15   :  { %p922_p8 = scmp.ne.s32.totalorder %s1094_s0, %s921_s7  ;;  %p925_p9 = scmp.lt.u32.totalorder %s921_s7, %s1094_s0 }
  0x17   :  { %p927_p10 = pnand %p925_p9, %p922_p8 }
  0x19   :  { %930 = shalt.err (!%p927_p10)
}
  0x1a   :  { %s931_s12 = scalar_lea.vmem %s1024_s18, 1024  ;;  %p936_p12 = scmp.lt.s32.totalorder %s1024_s18, %s1024_s18 }
  0x1b   :  { %p932_p11 = scmp.ne.s32.totalorder %s1024_s18, %s931_s12  ;;  %p937_p13 = scmp.lt.s32.totalorder %s931_s12, %s931_s12 }
  0x1d   :  { %p938_p0 = por %p937_p13, %p936_p12 }
  0x1f   :  { %p939_p1 = pnand %p938_p0, %p932_p11 }
  0x21   :  { %942 = shalt.err (!%p939_p1)
}
  0x22   :  { %23 = dma.hbm_to_vmem [thread:$0]  %s1094_s0, 1024, %s1024_s18, [#allocation4], %s995_s27, %s995_s27, %s996_s28  }
  0x23   :  { %s997_s14 = smov [#allocation8]   ;;  %s943_s19 = scalar_lea.hbm %s1096_s2, 1024 }
  0x24   :  { %s41_s15 = sshll.u32 %s997_s14, 4  ;;  %p944_p2 = scmp.ne.s32.totalorder %s1096_s2, %s943_s19  ;;  %s42_s15 = int_to_ptr.vmem [resolvable:$true] %s41_s15 }
  0x25   :  { %p947_p3 = scmp.lt.u32.totalorder %s943_s19, %s1096_s2 }
  0x27   :  { %p949_p4 = pnand %p947_p3, %p944_p2 }
  0x29   :  { %952 = shalt.err (!%p949_p4)
}
  0x2a   :  { %s953_s24 = scalar_lea.vmem %s42_s15, 1024  ;;  %p958_p6 = scmp.lt.s32.totalorder %s42_s15, %s42_s15 }
  0x2b   :  { %p954_p5 = scmp.ne.s32.totalorder %s42_s15, %s953_s24  ;;  %p959_p7 = scmp.lt.s32.totalorder %s953_s24, %s953_s24 }
  0x2d   :  { %p960_p8 = por %p959_p7, %p958_p6 }
  0x2f   :  { %p961_p9 = pnand %p960_p8, %p954_p5 }
  0x31   :  { %964 = shalt.err (!%p961_p9)
}
  0x32   :  { %47 = dma.hbm_to_vmem [thread:$0]  %s1096_s2, 1024, %s42_s15, [#allocation7], %s995_s27, %s995_s27, %s996_s28  }
  0x33   :  { %987 = dma.done.wait [#allocation4], 1024  }
  0x34   :  { %988 = vsyncadd [#allocation4], 4294966272 }
  0x35   :  { %989 = dma.done.wait [#allocation7], 2048  }
  0x36   :  { %990 = vsyncadd [#allocation7], 4294965248  ;;  %v875_v0 = vld [vmem:[#allocation6] sm:$0xff]   ;;  %v876_v1 = vld [vmem:[#allocation6 + $0x8] sm:$0xff]  }
  0x37   :  { %805 = vmatprep.subr.bf16.mxu0 %v875_v0  ;;  %v877_v2 = vld [vmem:[#allocation6 + $0x10] sm:$0xff]   ;;  %v878_v3 = vld [vmem:[#allocation6 + $0x18] sm:$0xff]   ;;  %v883_v4 = vld [vmem:[#allocation3] sm:$0xff]  }
  0x38   :  { %806 = vmatpush3.bf16.msra.mxu0 %v875_v0  ;;  %821 = vmatprep.mubr.bf16.mxu0 %v883_v4  ;;  %v879_v5 = vld [vmem:[#allocation6 + $0x20] sm:$0xff]   ;;  %v880_v6 = vld [vmem:[#allocation6 + $0x28] sm:$0xff]   ;;  %v881_v9 = vld [vmem:[#allocation6 + $0x30] sm:$0xff]  }
  0x39   :  { %807 = vmatprep.subr.bf16.mxu0 %v876_v1  ;;  %v891_v7 = vld [vmem:[#allocation8] sm:$0xff]   ;;  %v892_v8 = vld [vmem:[#allocation8 + $0x8] sm:$0xff]   ;;  %v893_v10 = vld [vmem:[#allocation8 + $0x10] sm:$0xff]  }
  0x3a   :  { %837 = vmatprep.subr.bf16.mxu1 %v891_v7  ;;  %v882_v11 = vld [vmem:[#allocation6 + $0x38] sm:$0xff]   ;;  %v895_v13 = vld [vmem:[#allocation8 + $0x20] sm:$0xff]   ;;  %v884_v14 = vld [vmem:[#allocation3 + $0x8] sm:$0xff]  }
  0x3b   :  { %838 = vmatpush3.bf16.msra.mxu1 %v891_v7  ;;  %v894_v12 = vld [vmem:[#allocation8 + $0x18] sm:$0xff]   ;;  %v885_v15 = vld [vmem:[#allocation3 + $0x10] sm:$0xff]   ;;  %v896_v16 = vld [vmem:[#allocation8 + $0x28] sm:$0xff]  }
  0x3c   :  { %808 = vmatpush3.bf16.msra.mxu0 %v876_v1  ;;  %839 = vmatprep.subr.bf16.mxu1 %v892_v8  ;;  %v897_v17 = vld [vmem:[#allocation8 + $0x30] sm:$0xff]   ;;  %v886_v18 = vld [vmem:[#allocation3 + $0x18] sm:$0xff]   ;;  %v887_v19 = vld [vmem:[#allocation3 + $0x20] sm:$0xff]  }
  0x3d   :  { %809 = vmatprep.subr.bf16.mxu0 %v877_v2  ;;  %v888_v20 = vld [vmem:[#allocation3 + $0x28] sm:$0xff]   ;;  %v889_v21 = vld [vmem:[#allocation3 + $0x30] sm:$0xff]   ;;  %v890_v22 = vld [vmem:[#allocation3 + $0x38] sm:$0xff]  }
  0x3e   :  { %v898_v23 = vld [vmem:[#allocation8 + $0x38] sm:$0xff]   ;;  %v685_v48 = vld [vmem:[%s1097_s3] ss:$0 sm:$0xff]  ;;  %s998_s3 = smov [#allocation9]  }
  0x3f   :  { %840 = vmatpush3.bf16.msra.mxu1 %v892_v8  ;;  %s654_s26 = sshll.u32 %s998_s3, 4  ;;  %s655_s26 = int_to_ptr.vmem [resolvable:$true] %s654_s26 }
  0x40   :  { %810 = vmatpush3.bf16.msra.mxu0 %v877_v2  ;;  %841 = vmatprep.subr.bf16.mxu1 %v893_v10  ;;  %s965_s29 = scalar_lea.vmem %s655_s26, 1024  ;;  %p970_p11 = scmp.lt.s32.totalorder %s655_s26, %s655_s26 }
  0x41   :  { %811 = vmatprep.subr.bf16.mxu0 %v878_v3  ;;  %p966_p10 = scmp.ne.s32.totalorder %s655_s26, %s965_s29  ;;  %p971_p12 = scmp.lt.s32.totalorder %s965_s29, %s965_s29 }
  0x43   :  { %842 = vmatpush3.bf16.msra.mxu1 %v893_v10  ;;  %p972_p13 = por %p971_p12, %p970_p11 }
  0x44   :  { %812 = vmatpush3.bf16.msra.mxu0 %v878_v3  ;;  %843 = vmatprep.subr.bf16.mxu1 %v894_v12 }
  0x45   :  { %813 = vmatprep.subr.bf16.mxu0 %v879_v5  ;;  %p973_p0 = pnand %p972_p13, %p966_p10 }
  0x47   :  { %844 = vmatpush3.bf16.msra.mxu1 %v894_v12 }
  0x48   :  { %814 = vmatpush3.bf16.msra.mxu0 %v879_v5  ;;  %845 = vmatprep.subr.bf16.mxu1 %v895_v13 }
  0x49   :  { %815 = vmatprep.subr.bf16.mxu0 %v880_v6 }
  0x4b   :  { %846 = vmatpush3.bf16.msra.mxu1 %v895_v13 }
  0x4c   :  { %816 = vmatpush3.bf16.msra.mxu0 %v880_v6  ;;  %847 = vmatprep.subr.bf16.mxu1 %v896_v16 }
  0x4d   :  { %817 = vmatprep.subr.bf16.mxu0 %v881_v9 }
  0x4f   :  { %848 = vmatpush3.bf16.msra.mxu1 %v896_v16 }
  0x50   :  { %818 = vmatpush3.bf16.msra.mxu0 %v881_v9  ;;  %849 = vmatprep.subr.bf16.mxu1 %v897_v17 }
  0x51   :  { %819 = vmatprep.subr.bf16.mxu0 %v882_v11 }
  0x53   :  { %850 = vmatpush3.bf16.msra.mxu1 %v897_v17 }
  0x54   :  { %820 = vmatpush3.bf16.msra.mxu0 %v882_v11  ;;  %851 = vmatprep.subr.bf16.mxu1 %v898_v23 }
  0x57   :  { %822 = vmatmul.mubr.bf16.vlgmr.msra.gmra.mrb[0].mxu0 %v884_v14  ;;  %852 = vmatpush3.bf16.msra.mxu1 %v898_v23 }
  0x58   :  { %825 = vmatprep.mubr.bf16.mxu0 %v885_v15 }
  0x5f   :  { %826 = vmatmul.mubr.bf16.gmra.mrb[4].mxu0 %v886_v18 }
  0x60   :  { %829 = vmatprep.mubr.bf16.mxu0 %v887_v19 }
  0x67   :  { %830 = vmatmul.mubr.bf16.gmra.mrb[8].mxu0 %v888_v20 }
  0x68   :  { %833 = vmatprep.mubr.bf16.mxu0 %v889_v21 }
  0x6f   :  { %834 = vmatmul.mubr.bf16.gmra.mrb[12].mxu0 %v890_v22 }
 0x12a   :  { %v823_v24 = vpop.f32.mrb[0].mxu0 }
 0x12b   :  { %v263_v25 = vpop.f32.mrb[1].mxu0 }
 0x12c   :  { %v824_v26 = vpop.f32.mrb[2].mxu0 }
 0x12d   :  { %v378_v27 = vpack.c.bf16 %v824_v26, %v823_v24  ;;  %v266_v28 = vpop.f32.mrb[3].mxu0 }
 0x12e   :  { %v377_v29 = vpack.c.bf16 %v266_v28, %v263_v25 }
 0x130   :  { %853 = vmatprep.mubr.bf16.mxu1 %v377_v29 }
 0x131   :  { %854 = vmatmul.mubr.bf16.vlgmr.msra.gmra.mrb[0].mxu1 %v378_v27 }
 0x132   :  { %v827_v30 = vpop.f32.mrb[4].mxu0 }
 0x133   :  { %v279_v31 = vpop.f32.mrb[5].mxu0 }
 0x134   :  { %v828_v32 = vpop.f32.mrb[6].mxu0 }
 0x135   :  { %v380_v33 = vpack.c.bf16 %v828_v32, %v827_v30  ;;  %v282_v34 = vpop.f32.mrb[7].mxu0 }
 0x136   :  { %v379_v35 = vpack.c.bf16 %v282_v34, %v279_v31 }
 0x138   :  { %857 = vmatprep.mubr.bf16.mxu1 %v379_v35 }
 0x139   :  { %858 = vmatmul.mubr.bf16.gmra.mrb[4].mxu1 %v380_v33 }
 0x13a   :  { %v831_v36 = vpop.f32.mrb[8].mxu0 }
 0x13b   :  { %v295_v37 = vpop.f32.mrb[9].mxu0 }
 0x13c   :  { %v832_v38 = vpop.f32.mrb[10].mxu0 }
 0x13d   :  { %v382_v39 = vpack.c.bf16 %v832_v38, %v831_v36  ;;  %v298_v40 = vpop.f32.mrb[11].mxu0 }
 0x13e   :  { %v381_v41 = vpack.c.bf16 %v298_v40, %v295_v37 }
 0x140   :  { %861 = vmatprep.mubr.bf16.mxu1 %v381_v41 }
 0x141   :  { %862 = vmatmul.mubr.bf16.gmra.mrb[8].mxu1 %v382_v39 }
 0x142   :  { %v835_v42 = vpop.f32.mrb[12].mxu0 }
 0x143   :  { %v311_v43 = vpop.f32.mrb[13].mxu0 }
 0x144   :  { %v836_v44 = vpop.f32.mrb[14].mxu0 }
 0x145   :  { %v384_v45 = vpack.c.bf16 %v836_v44, %v835_v42  ;;  %v314_v46 = vpop.f32.mrb[15].mxu0 }
 0x146   :  { %v383_v47 = vpack.c.bf16 %v314_v46, %v311_v43 }
 0x148   :  { %865 = vmatprep.mubr.bf16.mxu1 %v383_v47 }
 0x149   :  { %866 = vmatmul.mubr.bf16.gmra.mrb[12].mxu1 %v384_v45 }
 0x204   :  { %v855_v49 = vpop.f32.mrb[0].mxu1 }
 0x205   :  { %v499_v50 = vadd.f32 %v855_v49, %v685_v48  ;;  %v490_v51 = vpop.f32.mrb[1].mxu1 }
 0x206   :  { %v491_v52 = vadd.f32 %v685_v48, %v490_v51  ;;  %v856_v53 = vpop.f32.mrb[2].mxu1 }
 0x207   :  { %v502_v54 = vadd.f32 %v856_v53, %v685_v48  ;;  %v493_v55 = vpop.f32.mrb[3].mxu1  ;;  %v555_v57 = vmax.f32 %v499_v50, 0.0 }
 0x208   :  { %v494_v56 = vadd.f32 %v685_v48, %v493_v55  ;;  %v553_v59 = vmax.f32 %v491_v52, 0.0 }
 0x209   :  { %v556_v58 = vmax.f32 %v502_v54, 0.0 }
 0x20a   :  { %v554_v60 = vmax.f32 %v494_v56, 0.0 }
 0x20b   :  { %v734_v61 = vpack.c.bf16 %v556_v58, %v555_v57 }
 0x20c   :  { %v729_v62 = vpack.c.bf16 %v554_v60, %v553_v59  ;;  %v859_v63 = vpop.f32.mrb[4].mxu1 }
 0x20d   :  { %766 = vst [vmem:[#allocation9 + $0x8] sm:$0xff] %v734_v61   ;;  %v515_v0 = vadd.f32 %v859_v63, %v685_v48  ;;  %v506_v1 = vpop.f32.mrb[5].mxu1 }
 0x20e   :  { %730 = vst [vmem:[#allocation9] sm:$0xff] %v729_v62   ;;  %v507_v2 = vadd.f32 %v685_v48, %v506_v1  ;;  %v860_v3 = vpop.f32.mrb[6].mxu1 }
 0x20f   :  { %v518_v4 = vadd.f32 %v860_v3, %v685_v48  ;;  %v509_v5 = vpop.f32.mrb[7].mxu1  ;;  %v559_v7 = vmax.f32 %v515_v0, 0.0 }
 0x210   :  { %v510_v6 = vadd.f32 %v685_v48, %v509_v5  ;;  %v557_v9 = vmax.f32 %v507_v2, 0.0 }
 0x211   :  { %v560_v8 = vmax.f32 %v518_v4, 0.0 }
 0x212   :  { %v558_v10 = vmax.f32 %v510_v6, 0.0 }
 0x213   :  { %v744_v11 = vpack.c.bf16 %v560_v8, %v559_v7 }
 0x214   :  { %v739_v12 = vpack.c.bf16 %v558_v10, %v557_v9  ;;  %v863_v13 = vpop.f32.mrb[8].mxu1 }
 0x215   :  { %768 = vst [vmem:[#allocation9 + $0x18] sm:$0xff] %v744_v11   ;;  %v531_v14 = vadd.f32 %v863_v13, %v685_v48  ;;  %v522_v15 = vpop.f32.mrb[9].mxu1 }
 0x216   :  { %767 = vst [vmem:[#allocation9 + $0x10] sm:$0xff] %v739_v12   ;;  %v523_v16 = vadd.f32 %v685_v48, %v522_v15  ;;  %v864_v17 = vpop.f32.mrb[10].mxu1 }
 0x217   :  { %v534_v18 = vadd.f32 %v864_v17, %v685_v48  ;;  %v525_v19 = vpop.f32.mrb[11].mxu1  ;;  %v563_v21 = vmax.f32 %v531_v14, 0.0 }
 0x218   :  { %v526_v20 = vadd.f32 %v685_v48, %v525_v19  ;;  %v561_v23 = vmax.f32 %v523_v16, 0.0 }
 0x219   :  { %v564_v22 = vmax.f32 %v534_v18, 0.0 }
 0x21a   :  { %v562_v24 = vmax.f32 %v526_v20, 0.0 }
 0x21b   :  { %v754_v25 = vpack.c.bf16 %v564_v22, %v563_v21 }
 0x21c   :  { %v749_v26 = vpack.c.bf16 %v562_v24, %v561_v23  ;;  %v867_v27 = vpop.f32.mrb[12].mxu1 }
 0x21d   :  { %770 = vst [vmem:[#allocation9 + $0x28] sm:$0xff] %v754_v25   ;;  %v547_v28 = vadd.f32 %v867_v27, %v685_v48  ;;  %v538_v29 = vpop.f32.mrb[13].mxu1 }
 0x21e   :  { %769 = vst [vmem:[#allocation9 + $0x20] sm:$0xff] %v749_v26   ;;  %v539_v30 = vadd.f32 %v685_v48, %v538_v29  ;;  %v868_v31 = vpop.f32.mrb[14].mxu1 }
 0x21f   :  { %v550_v32 = vadd.f32 %v868_v31, %v685_v48  ;;  %v541_v33 = vpop.f32.mrb[15].mxu1  ;;  %v567_v35 = vmax.f32 %v547_v28, 0.0 }
 0x220   :  { %v542_v34 = vadd.f32 %v685_v48, %v541_v33  ;;  %v565_v37 = vmax.f32 %v539_v30, 0.0 }
 0x221   :  { %v568_v36 = vmax.f32 %v550_v32, 0.0 }
 0x222   :  { %v566_v38 = vmax.f32 %v542_v34, 0.0 }
 0x223   :  { %v764_v39 = vpack.c.bf16 %v568_v36, %v567_v35 }
 0x224   :  { %v759_v40 = vpack.c.bf16 %v566_v38, %v565_v37 }
 0x225   :  { %772 = vst [vmem:[#allocation9 + $0x38] sm:$0xff] %v764_v39  }
 0x226   :  { %771 = vst [vmem:[#allocation9 + $0x30] sm:$0xff] %v759_v40  }
 0x227   :  { %976 = shalt.err (!%p973_p0)
}
 0x228   :  { %s977_s6 = scalar_lea.hbm %s1098_s4, 1024 }
 0x229   :  { %p978_p1 = scmp.ne.s32.totalorder %s1098_s4, %s977_s6  ;;  %p981_p2 = scmp.lt.u32.totalorder %s977_s6, %s1098_s4 }
 0x22b   :  { %p983_p3 = pnand %p981_p2, %p978_p1 }
 0x22d   :  { %986 = shalt.err (!%p983_p3)
}
 0x22e   :  { %660 = dma.vmem_to_hbm [thread:$0]  %s655_s26, 1024, %s1098_s4, [#allocation5], %s995_s27, %s995_s27, %s996_s28  }
 0x22f   :  { %991 = dma.done.wait [#allocation5], 1024  }
 0x230   :  { %992 = vsyncadd [#allocation5], 4294966272 }
 0x231   :  { %664 = vsyncpa [#allocation4], 1 }
 0x232   :  { %665 = vsyncpa [#allocation7], 1 }
 0x233   :  { %666 = vsyncpa [#allocation5], 1 }

</bundles_post_ra>
